<compile_context>
chip_gen: v7x
topology: tpu7x:2x2x1
jax: 0.10.0
libtpu: 0.0.40
codegen_flags: <defaults>
</compile_context>

<pallas_src>
import functools
import math

import jax
import jax.numpy as jnp
from jax import lax
from jax.experimental import pallas as pl
from jax.experimental.pallas import tpu as pltpu

_LANE = 128
_PROJ_ROW_TILE = 512     # row tile for the linear projections
_ATTN_Q_TILE = 256       # query-row tile for the attention core
_VMEM_LIMIT = 48 * 1024 * 1024   # above v5e/v6e scoped defaults, under v7x 64 MiB


def _row_tile(dim, max_tile):
    # block second-minor dim must be a multiple of 8 or the full dim
    return dim if dim <= max_tile else max_tile


def _fits_lane_tiling(E, N):
    # slicing an (L, N*E) view into E-wide column blocks needs E % 128 == 0
    return N == 1 or (E % _LANE == 0)


def _squeeze_leading(a):
    while a.ndim > 2:
        a = a[0]
    return a


# ----------------------------------------------------------------------------
# Linear kernel (shared by input and output projections)
# ----------------------------------------------------------------------------
def _linear_kernel(x_ref, w_ref, b_ref, o_ref, *, compute_dtype):
    x = _squeeze_leading(x_ref[...]).astype(compute_dtype)   # (TM, E_in)
    w = _squeeze_leading(w_ref[...]).astype(compute_dtype)   # (E_out, E_in)
    b = _squeeze_leading(b_ref[...])                         # (1, E_out)
    # y = x @ W.T without any in-kernel transpose: contract on in_features.
    y = lax.dot_general(x, w, (((1,), (1,)), ((), ())),
                        preferred_element_type=jnp.float32)
    y = (y + b.astype(jnp.float32)).astype(o_ref.dtype)
    o_ref[...] = y.reshape(o_ref.shape)


def _in_projection(x, w_pk, b_pk, *, compute_dtype, out_dtype,
                   row_tile=_PROJ_ROW_TILE):
    """x: (Lx, N, E) seq-major. w_pk: (P, E, E). b_pk: (P, 1, E).
    Returns (P, N, Lx, E) batch-major projections."""
    Lx, N, E = x.shape
    P = w_pk.shape[0]
    w_pk = w_pk.astype(compute_dtype)
    TL = _row_tile(Lx, row_tile)
    nlt = pl.cdiv(Lx, TL)

    if _fits_lane_tiling(E, N):
        # No XLA transpose: batch selection is a lane-aligned column block of
        # the free (Lx, N*E) view.
        x_in = x.reshape(Lx, N * E)
        x_spec = pl.BlockSpec((TL, E), lambda n, lt, p: (lt, n))
    else:
        # TODO(synk): unaligned E fallback — one XLA transpose of the input.
        x_in = jnp.transpose(x, (1, 0, 2))            # (N, Lx, E)
        x_spec = pl.BlockSpec((1, TL, E), lambda n, lt, p: (n, lt, 0))

    return pl.pallas_call(
        functools.partial(_linear_kernel, compute_dtype=compute_dtype),
        out_shape=jax.ShapeDtypeStruct((P, N, Lx, E), out_dtype),
        grid=(N, nlt, P),                     # P innermost -> x block re-used
        in_specs=[
            x_spec,
            pl.BlockSpec((1, E, E), lambda n, lt, p: (p, 0, 0)),
            pl.BlockSpec((1, 1, E), lambda n, lt, p: (p, 0, 0)),
        ],
        out_specs=pl.BlockSpec((1, 1, TL, E), lambda n, lt, p: (p, n, lt, 0)),
        compiler_params=pltpu.CompilerParams(
            dimension_semantics=("parallel", "parallel", "arbitrary"),
            vmem_limit_bytes=_VMEM_LIMIT,
        ),
    )(x_in, w_pk, b_pk)


def _out_projection(x_bm, w, b, *, compute_dtype, out_dtype,
                    row_tile=_PROJ_ROW_TILE):
    """x_bm: (N, L, E) batch-major attention output. Returns (L, N, E)."""
    N, L, E = x_bm.shape
    TL = _row_tile(L, row_tile)
    nlt = pl.cdiv(L, TL)
    w3 = w.astype(compute_dtype).reshape(1, E, E)
    b3 = b.reshape(1, 1, E)

    aligned = _fits_lane_tiling(E, N)
    if aligned:
        # Write straight back into the seq-major layout via the out_spec.
        out_shape = jax.ShapeDtypeStruct((L, N * E), out_dtype)
        out_spec = pl.BlockSpec((TL, E), lambda n, lt: (lt, n))
    else:
        out_shape = jax.ShapeDtypeStruct((N, L, E), out_dtype)
        out_spec = pl.BlockSpec((1, TL, E), lambda n, lt: (n, lt, 0))

    y = pl.pallas_call(
        functools.partial(_linear_kernel, compute_dtype=compute_dtype),
        out_shape=out_shape,
        grid=(N, nlt),
        in_specs=[
            pl.BlockSpec((1, TL, E), lambda n, lt: (n, lt, 0)),
            pl.BlockSpec((1, E, E), lambda n, lt: (0, 0, 0)),
            pl.BlockSpec((1, 1, E), lambda n, lt: (0, 0, 0)),
        ],
        out_specs=out_spec,
        compiler_params=pltpu.CompilerParams(
            dimension_semantics=("parallel", "parallel"),
            vmem_limit_bytes=_VMEM_LIMIT,
        ),
    )(x_bm, w3, b3)
    if aligned:
        return y.reshape(L, N, E)
    # TODO(synk): unaligned E fallback — one XLA transpose back to (L, N, E).
    return jnp.transpose(y, (1, 0, 2))


# ----------------------------------------------------------------------------
# Attention core kernel
# ----------------------------------------------------------------------------
def _make_attn_kernel(num_heads, head_dim, kernel_f, compute_dtype, weights_mode):
    def kernel(q_ref, k_ref, v_ref, *out_refs):
        o_ref = out_refs[0]
        q = q_ref[0, 0].astype(compute_dtype)   # (TLq, E)
        k = k_ref[0, 0].astype(compute_dtype)   # (S,   E)
        v = v_ref[0, 0].astype(compute_dtype)   # (S,   E)

        head_outs = []
        w_acc = None
        w_heads = []
        for h in range(num_heads):              # static head loop, VMEM slices
            cols = slice(h * head_dim, (h + 1) * head_dim)
            scores = kernel_f(q[:, cols], k[:, cols]).astype(jnp.float32)
            m = jnp.max(scores, axis=-1, keepdims=True)
            p = jnp.exp(scores - m)
            denom = jnp.sum(p, axis=-1, keepdims=True)
            attn = p * pl.reciprocal(denom, approx=True)   # EUP, frees VALU
            head_outs.append(
                jnp.dot(attn.astype(v.dtype), v[:, cols],
                        preferred_element_type=jnp.float32))
            if weights_mode == "avg":
                w_acc = attn if w_acc is None else w_acc + attn
            elif weights_mode == "per_head":
                w_heads.append(attn)

        o_ref[0] = jnp.concatenate(head_outs, axis=-1).astype(o_ref.dtype)
        if weights_mode == "avg":
            out_refs[1][0] = (w_acc * (1.0 / num_heads)).astype(out_refs[1].dtype)
        elif weights_mode == "per_head":
            out_refs[1][0] = jnp.stack(w_heads, axis=0).astype(out_refs[1].dtype)

    return kernel


def _attention(q4, qi, k4, ki, v4, vi, *, num_heads, kernel_f, compute_dtype,
               need_weights, average_attn_weights, out_dtype,
               q_row_tile=_ATTN_Q_TILE):
    _, N, L, E = q4.shape
    S = k4.shape[2]
    Dh = E // num_heads
    TLq = _row_tile(L, q_row_tile)
    nlt = pl.cdiv(L, TLq)

    def q_map(p):
        return lambda n, lt: (p, n, lt, 0)

    def kv_map(p):
        return lambda n, lt: (p, n, 0, 0)

    out_shapes = [jax.ShapeDtypeStruct((N, L, E), out_dtype)]
    out_specs = [pl.BlockSpec((1, TLq, E), lambda n, lt: (n, lt, 0))]
    weights_mode = "none"
    if need_weights and average_attn_weights:
        weights_mode = "avg"                      # write H x smaller tensor
        out_shapes.append(jax.ShapeDtypeStruct((N, L, S), jnp.float32))
        out_specs.append(pl.BlockSpec((1, TLq, S), lambda n, lt: (n, lt, 0)))
    elif need_weights:
        weights_mode = "per_head"
        out_shapes.append(jax.ShapeDtypeStruct((N, num_heads, L, S), jnp.float32))
        out_specs.append(
            pl.BlockSpec((1, num_heads, TLq, S), lambda n, lt: (n, 0, lt, 0)))

    results = pl.pallas_call(
        _make_attn_kernel(num_heads, Dh, kernel_f, compute_dtype, weights_mode),
        out_shape=tuple(out_shapes),
        grid=(N, nlt),
        in_specs=[
            pl.BlockSpec((1, 1, TLq, E), q_map(qi)),
            pl.BlockSpec((1, 1, S, E), kv_map(ki)),
            pl.BlockSpec((1, 1, S, E), kv_map(vi)),
        ],
        out_specs=tuple(out_specs),
        compiler_params=pltpu.CompilerParams(
            dimension_semantics=("parallel", "parallel"),
            vmem_limit_bytes=_VMEM_LIMIT,
        ),
    )(q4, k4, v4)

    attn_bm = results[0]
    attn_w = results[1] if weights_mode != "none" else None
    return attn_bm, attn_w


# ----------------------------------------------------------------------------
# kernel_f instance: scaled dot-product similarity (no in-kernel transpose)
# ----------------------------------------------------------------------------
def scaled_dot_kernel_f(q, k):
    scale = 1.0 / math.sqrt(q.shape[-1])
    s = lax.dot_general(q, k, (((1,), (1,)), ((), ())),
                        preferred_element_type=jnp.float32)
    return s * scale


# ----------------------------------------------------------------------------
# Forward pass
# ----------------------------------------------------------------------------
def kernel_multihead_attention_forward(
    query, key, value, params, num_heads, kernel_f,
    need_weights=True, average_attn_weights=True, mxu_dtype=None,
):
    """mxu_dtype: None keeps the module's dtype end-to-end; jnp.bfloat16 runs the
    MXU matmuls / intermediate activations in bf16 with fp32 accumulation."""
    L, N, E = query.shape
    S = key.shape[0]
    assert key.shape == value.shape
    assert key.shape[2] == E and value.shape[2] == E   # _qkv_same_embed_dim path
    Dh = E // num_heads
    assert Dh * num_heads == E, "embed_dim must be divisible by num_heads"

    w_in, b_in = params["in_proj_weight"], params["in_proj_bias"]
    w_out, b_out = params["out_proj_weight"], params["out_proj_bias"]

    compute_dtype = mxu_dtype if mxu_dtype is not None else query.dtype
    inter_dtype = compute_dtype   # q/k/v + attn-out intermediates

    if (query is key) and (key is value):
        # Self-attention: single fused QKV projection with the packed weight.
        qkv = _in_projection(
            query, w_in.reshape(3, E, E), b_in.reshape(3, 1, E),
            compute_dtype=compute_dtype, out_dtype=inter_dtype)
        q4 = k4 = v4 = qkv
        qi, ki, vi = 0, 1, 2
    else:
        q4 = _in_projection(query, w_in[:E].reshape(1, E, E),
                            b_in[:E].reshape(1, 1, E),
                            compute_dtype=compute_dtype, out_dtype=inter_dtype)
        k4 = _in_projection(key, w_in[E:2 * E].reshape(1, E, E),
                            b_in[E:2 * E].reshape(1, 1, E),
                            compute_dtype=compute_dtype, out_dtype=inter_dtype)
        v4 = _in_projection(value, w_in[2 * E:].reshape(1, E, E),
                            b_in[2 * E:].reshape(1, 1, E),
                            compute_dtype=compute_dtype, out_dtype=inter_dtype)
        qi = ki = vi = 0

    attn_bm, attn_w = _attention(
        q4, qi, k4, ki, v4, vi, num_heads=num_heads, kernel_f=kernel_f,
        compute_dtype=compute_dtype, need_weights=need_weights,
        average_attn_weights=average_attn_weights, out_dtype=inter_dtype)

    out = _out_projection(attn_bm, w_out, b_out, compute_dtype=compute_dtype,
                          out_dtype=query.dtype)
    return out, attn_w


# ----------------------------------------------------------------------------
# Pure-JAX reference (for correctness validation only)
# ----------------------------------------------------------------------------
def _reference_forward(query, key, value, params, num_heads,
                       average_attn_weights=True):
    L, N, E = query.shape
    S = key.shape[0]
    Dh = E // num_heads
    w_in, b_in = params["in_proj_weight"], params["in_proj_bias"]
    w_out, b_out = params["out_proj_weight"], params["out_proj_bias"]
    q = query.reshape(L * N, E) @ w_in[:E].T + b_in[:E]
    k = key.reshape(S * N, E) @ w_in[E:2 * E].T + b_in[E:2 * E]
    v = value.reshape(S * N, E) @ w_in[2 * E:].T + b_in[2 * E:]
    q = q.reshape(L, N * num_heads, Dh).transpose(1, 0, 2)
    k = k.reshape(S, N * num_heads, Dh).transpose(1, 0, 2)
    v = v.reshape(S, N * num_heads, Dh).transpose(1, 0, 2)
    scores = jnp.einsum("bld,bsd->bls", q, k) / math.sqrt(Dh)
    attn = jax.nn.softmax(scores, axis=-1)
    out = jnp.einsum("bls,bsd->bld", attn, v)
    out = out.transpose(1, 0, 2).reshape(L * N, E)
    out = (out @ w_out.T + b_out).reshape(L, N, E)
    attn_w = attn.reshape(N, num_heads, L, S)
    if average_attn_weights:
        attn_w = attn_w.mean(axis=1)
    return out, attn_w


# ----------------------------------------------------------------------------
# Deterministic parameter init (mirrors __init__/_reset_parameters)
# ----------------------------------------------------------------------------
def init_params(key, embed_dim):
    k1, k2 = jax.random.split(key)
    bound_in = math.sqrt(6.0 / (3 * embed_dim + embed_dim))   # xavier_uniform_
    in_proj_weight = jax.random.uniform(
        k1, (3 * embed_dim, embed_dim), jnp.float32, -bound_in, bound_in)
    in_proj_bias = jnp.zeros((3 * embed_dim,), jnp.float32)   # constant_(0.)
    bound_out = 1.0 / math.sqrt(embed_dim)
    out_proj_weight = jax.random.uniform(
        k2, (embed_dim, embed_dim), jnp.float32, -bound_out, bound_out)
    out_proj_bias = jnp.zeros((embed_dim,), jnp.float32)      # constant_(0.)
    return {
        "in_proj_weight": in_proj_weight,
        "in_proj_bias": in_proj_bias,
        "out_proj_weight": out_proj_weight,
        "out_proj_bias": out_proj_bias,
    }


# ----------------------------------------------------------------------------
if __name__ == "__main__":
    embed_dim = 128      # lane-aligned embed dim -> zero-transpose fast path
    num_heads = 4        # head_dim = 32
    L = S = 64
    N = 2

    root = jax.random.PRNGKey(0)
    kp, kx, kq2, kk2 = jax.random.split(root, 4)
    params = init_params(kp, embed_dim)

    # Self-attention (query is key is value) -> fused QKV projection path.
    x = jax.random.normal(kx, (L, N, embed_dim), jnp.float32)

    # 1) bf16 MXU path (performance configuration), averaged attention weights.
    out_bf16, w_bf16 = kernel_multihead_attention_forward(
        x, x, x, params, num_heads, scaled_dot_kernel_f,
        need_weights=True, average_attn_weights=True, mxu_dtype=jnp.bfloat16)
    jax.block_until_ready((out_bf16, w_bf16))
    assert out_bf16.shape == (L, N, embed_dim)
    assert w_bf16.shape == (N, L, S)
    assert jnp.allclose(w_bf16.sum(-1), 1.0, atol=1e-2)

    # 2) fp32 path vs. pure-JAX reference.
    out_f32, w_f32 = kernel_multihead_attention_forward(
        x, x, x, params, num_heads, scaled_dot_kernel_f,
        need_weights=True, average_attn_weights=True, mxu_dtype=None)
    ref_out, ref_w = _reference_forward(x, x, x, params, num_heads)
    jax.block_until_ready((out_f32, w_f32))
    assert jnp.allclose(out_f32, ref_out, atol=2e-2, rtol=2e-2)
    assert jnp.allclose(w_f32, ref_w, atol=2e-2, rtol=2e-2)

    # 3) Cross-attention (distinct q/k/v, S != L), need_weights=False variant
    #    (no attention-weights allocation/writeback at all).
    S2 = 32
    q2 = jax.random.normal(kq2, (L, N, embed_dim), jnp.float32)
    k2 = jax.random.normal(kk2, (S2, N, embed_dim), jnp.float32)
    v2 = jax.random.normal(jax.random.PRNGKey(7), (S2, N, embed_dim), jnp.float32)
    out_x, w_none = kernel_multihead_attention_forward(
        q2, k2, v2, params, num_heads, scaled_dot_kernel_f,
        need_weights=False, mxu_dtype=None)
    ref_x, _ = _reference_forward(q2, k2, v2, params, num_heads)
    jax.block_until_ready(out_x)
    assert w_none is None
    assert out_x.shape == (L, N, embed_dim)
    assert jnp.allclose(out_x, ref_x, atol=2e-2, rtol=2e-2)

    print("KERNEL_OK")
</pallas_src>

<mosaic_0001>
module attributes {stable_mosaic.version = 11 : i64} {
  func.func @_linear_kernel(%arg0: i32, %arg1: i32, %arg2: i32, %arg3: memref<64x128xf32, #tpu.memory_space<vmem>>, %arg4: memref<1x128x128xbf16, #tpu.memory_space<vmem>>, %arg5: memref<1x1x128xf32, #tpu.memory_space<vmem>>, %arg6: memref<1x1x64x128xbf16, #tpu.memory_space<vmem>>) attributes {dimension_semantics = [#tpu.dimension_semantics<parallel>, #tpu.dimension_semantics<parallel>, #tpu.dimension_semantics<arbitrary>], iteration_bounds = array<i64: 2, 1, 3>, scalar_prefetch = 0 : i64, scratch_operands = 0 : i64, tpu.core_type = #tpu.core_type<tc>, window_params = [{transform_indices = @transform_0, window_bounds = array<i64: 64, 128>}, {transform_indices = @transform_1, window_bounds = array<i64: 1, 128, 128>}, {transform_indices = @transform_2, window_bounds = array<i64: 1, 1, 128>}, {transform_indices = @transform_3, window_bounds = array<i64: 1, 1, 64, 128>}]} {
    %c0 = arith.constant 0 : index
    %c0_0 = arith.constant 0 : index
    %0 = vector.load %arg3[%c0, %c0_0] : memref<64x128xf32, #tpu.memory_space<vmem>>, vector<64x128xf32>
    %1 = arith.truncf %0 : vector<64x128xf32> to vector<64x128xbf16>
    %c0_1 = arith.constant 0 : index
    %c0_2 = arith.constant 0 : index
    %c0_3 = arith.constant 0 : index
    %2 = vector.load %arg4[%c0_1, %c0_2, %c0_3] : memref<1x128x128xbf16, #tpu.memory_space<vmem>>, vector<1x128x128xbf16>
    %3 = vector.shape_cast %2 : vector<1x128x128xbf16> to vector<128x128xbf16>
    %c0_4 = arith.constant 0 : index
    %c0_5 = arith.constant 0 : index
    %c0_6 = arith.constant 0 : index
    %4 = vector.load %arg5[%c0_4, %c0_5, %c0_6] : memref<1x1x128xf32, #tpu.memory_space<vmem>>, vector<1x1x128xf32>
    %5 = vector.shape_cast %4 : vector<1x1x128xf32> to vector<1x128xf32>
    %cst = arith.constant dense<0.000000e+00> : vector<64x128xf32>
    %6 = tpu.matmul %1, %3, %cst {dimension_numbers = #tpu.dot_dimension_numbers<[1], [1], [0], [0], [0, 0, 1, 0], [], []>} : vector<64x128xbf16>, vector<128x128xbf16>, vector<64x128xf32> -> vector<64x128xf32>
    %7 = vector.broadcast %5 : vector<1x128xf32> to vector<64x128xf32>
    %8 = arith.addf %6, %7 : vector<64x128xf32>
    %9 = arith.truncf %8 : vector<64x128xf32> to vector<64x128xbf16>
    %10 = vector.shape_cast %9 : vector<64x128xbf16> to vector<1x1x64x128xbf16>
    %c0_7 = arith.constant 0 : index
    %c0_8 = arith.constant 0 : index
    %c0_9 = arith.constant 0 : index
    %c0_10 = arith.constant 0 : index
    %11 = vector.load %arg6[%c0_7, %c0_8, %c0_9, %c0_10] : memref<1x1x64x128xbf16, #tpu.memory_space<vmem>>, vector<1x1x64x128xbf16>
    tpu.vector_store %arg6[%c0_7, %c0_8, %c0_9, %c0_10], %10 {strides = array<i32>} : memref<1x1x64x128xbf16, #tpu.memory_space<vmem>>, vector<1x1x64x128xbf16>,
    return
  }
  func.func @transform_0(%arg0: i32, %arg1: i32, %arg2: i32) -> (i32, i32) {
    %c0_i32 = arith.constant 0 : i32
    return %arg1, %arg0 : i32, i32
  }
  func.func @transform_1(%arg0: i32, %arg1: i32, %arg2: i32) -> (i32, i32, i32) {
    %c0_i32 = arith.constant 0 : i32
    %c0_i32_0 = arith.constant 0 : i32
    %c0_i32_1 = arith.constant 0 : i32
    return %arg2, %c0_i32, %c0_i32_0 : i32, i32, i32
  }
  func.func @transform_2(%arg0: i32, %arg1: i32, %arg2: i32) -> (i32, i32, i32) {
    %c0_i32 = arith.constant 0 : i32
    %c0_i32_0 = arith.constant 0 : i32
    %c0_i32_1 = arith.constant 0 : i32
    return %arg2, %c0_i32, %c0_i32_0 : i32, i32, i32
  }
  func.func @transform_3(%arg0: i32, %arg1: i32, %arg2: i32) -> (i32, i32, i32, i32) {
    %c0_i32 = arith.constant 0 : i32
    %c0_i32_0 = arith.constant 0 : i32
    return %arg2, %arg0, %arg1, %c0_i32 : i32, i32, i32, i32
  }
}

</mosaic_0001>

<bundles_post_ra>
// kernel: tpu_custom_call.1
= control target key start
LH: loop header
LB: loop body
LE: loop exit
PB: predicated region body
PF: predicated region fallthrough
CT: control target
= control target key end

     0   :  { %s1484_s0 = inlined_call_operand.hbm [shape: f32[64,256], index: 0, kind: input, shape index: {}]   ;;  %s1485_s1 = inlined_call_operand.hbm [shape: bf16[3,128,128], index: 1, kind: input, shape index: {}]   ;;  %s1486_s2 = inlined_call_operand.vmem [shape: f32[3,1,128], index: 2, kind: input, shape index: {}]   ;;  %s1487_s3 = inlined_call_operand.hbm [shape: bf16[3,2,64,128], index: 3, kind: output, shape index: {}]  }
   0x1   :  { %1498 = sst [smem:[#allocation15_spill]] %s1484_s0 }
   0x2   :  { %1499 = sst [smem:[#allocation16_spill]] %s1487_s3 }
   0x3   :  { %8 = vsyncpa [#allocation3], 0 }
   0x4   :  { %10 = vsyncpa [#allocation3 + $0x1], 0 }
   0x5   :  { %11 = vsyncpa [#allocation6], 0 }
   0x6   :  { %13 = vsyncpa [#allocation6 + $0x1], 0 }
   0x7   :  { %14 = vsyncpa [#allocation4], 0 }
   0x8   :  { %16 = vsyncpa [#allocation4 + $0x1], 0  ;;  %s1113_s12 = smov 0   ;;  %s1115_s13 = smov 0  }
   0x9   :  { %s1117_s14 = smov 0   ;;  %s1119_s15 = smov 0  }
   0xa   :  { %s1121_s16 = smov 0   ;;  %s1123_s17 = smov 0  }
   0xb   :  { %s1125_s18 = smov 0   ;;  %s1127_s19 = smov 0  }
   0xc   :  { %s1129_s20 = smov 0   ;;  %s1131_s21 = smov 0  }
   0xd   :  { %s1133_s22 = smov 0   ;;  %s1135_s23 = smov 0  }
   0xe   :  { %s1137_s24 = smov 0   ;;  %s1139_s25 = smov 0  }
   0xf LB: > { %1500 = sst [smem:[#allocation11_spill]] %s1073_s23  ;;  %s41_s26 = sadd.s32 1, %s1077_s24  ;;  %s1081_s25 = sphi %s1139_s25, %s22_s25   ;;  %s1077_s24 = sphi %s1137_s24, %s1528_s24   ;;  %s1073_s23 = sphi %s1135_s23, %s1527_s23   ;;  %s1069_s22 = sphi %s1133_s22, %s1526_s22   ;;  %s1065_s21 = sphi %s1131_s21, %s1525_s21   ;;  %s1061_s20 = sphi %s1129_s20, %s1538_s20   ;;  %s1057_s19 = sphi %s1127_s19, %s1537_s19   ;;  %s1053_s18 = sphi %s1125_s18, %s1536_s18   ;;  %s1049_s17 = sphi %s1123_s17, %s1535_s17   ;;  %s1045_s16 = sphi %s1121_s16, %s1534_s16   ;;  %s1041_s15 = sphi %s1119_s15, %s1533_s15   ;;  %s1037_s14 = sphi %s1117_s14, %s1532_s14   ;;  %s1033_s13 = sphi %s1115_s13, %s1531_s13   ;;  %s1029_s12 = sphi %s1113_s12, %s1530_s12  }
  0x10   : > { %1501 = sst [smem:[#allocation12_spill]] %s1077_s24  ;;  %p57_p0 = scmp.ne.s32.totalorder %s1061_s20, %s1057_s19 }
  0x11   : > { %p1489_p1 = scmp.eq.s32.totalorder %s1081_s25, 0  ;;  %p1488_p4 = scmp.lt.s32.totalorder %s1081_s25, 6 }
  0x12   : > { %s169_s28 = sand.u32 1, %s1061_s20   ;;  %s610_s29 = sshll.u32 %s1077_s24, 7 }
  0x13   : > { %p59_p3 = por %p1489_p1, %p57_p0  ;;  %s609_s30 = sshll.u32 %s169_s28, 6 }
  0x14   : > { %s1502_s0 = sld [smem:[#allocation15_spill]]  ;;  %s173_s7 = scalar_lea.vmem [#allocation2], %s609_s30 }
  0x15   : > { %s182_s8 = sshll.u32 %s173_s7, 4  ;;  %p1202_p5 = pnand %p1488_p4, %p59_p3  ;;  %s1206_s8 = int_to_ptr.vmem [resolvable:$true] %s182_s8 }
  0x16   : > { %p614_p6 = scmp.ge.s32.totalorder %s1081_s25, 1  ;;  %s1209_s10 = scalar_lea.sflag [#allocation3], %s169_s28 }
  0x17   : > { %p873_p8 = pneg %p1202_p5 }
  0x1a   : > { %s1198_s6 = scalar_lea.hbm %s1502_s0, %s610_s29  ;;  %s876_s4 = scalar_lea.hbm %s1502_s0, 2048 }
  0x1b   : > { %s871_s11 = scalar_lea.hbm %s1198_s6, 1024  ;;  %p877_p11 = scmp.lt.u32.totalorder %s1198_s6, %s1502_s0 }
  0x1c   : > { %p872_p7 = scmp.ne.s32.totalorder %s1198_s6, %s871_s11  ;;  %p878_p12 = scmp.lt.u32.totalorder %s876_s4, %s871_s11 }
  0x1d   : > { %p880_p0 = scmp.lt.u32.totalorder %s871_s11, %s1198_s6 }
  0x1e   : > { %p874_p9 = pnand %p873_p8, %p872_p7  ;;  %p879_p13 = por %p878_p12, %p877_p11 }
  0x20   : > { %p875_p10 = pneg %p874_p9  ;;  %p881_p3 = por %p880_p0, %p879_p13 }
  0x22   : > { %p882_p4 = pnand %p881_p3, %p875_p10 }
  0x24   : > { %885 = shalt.err (!%p882_p4)
}
  0x25   : > { %s886_s28 = scalar_lea.vmem %s1206_s8, 1024  ;;  %s1083_s29 = smov [#allocation2]  }
  0x26   : > { %p887_p7 = scmp.ne.s32.totalorder %s1206_s8, %s886_s28  ;;  %s891_s30 = sshll.u32 %s1083_s29, 4  ;;  %s892_s30 = int_to_ptr.vmem [resolvable:$false] %s891_s30 }
  0x27   : > { %s893_s5 = scalar_lea.vmem %s892_s30, 2048  ;;  %p894_p2 = scmp.lt.s32.totalorder %s1206_s8, %s892_s30 }
  0x28   : > { %p889_p9 = pnand %p887_p7, %p873_p8  ;;  %p895_p11 = scmp.lt.s32.totalorder %s893_s5, %s886_s28 }
  0x2a   : > { %p890_p1 = pneg %p889_p9  ;;  %p896_p12 = por %p895_p11, %p894_p2 }
  0x2c   : > { %p897_p13 = pnand %p896_p12, %p890_p1 }
  0x2e   : > { %900 = shalt.err (!%p897_p13)
}
  0x2f   : > { %s1084_s11 = smov 256   ;;  %s1085_s4 = smov 128  }
  0x30   : > { %s1086_s7 = smov 8   ;;  %p217_p1 = scmp.lt.s32.totalorder %s1081_s25, 7 }
  0x31   : > { %734 = dma.hbm_to_vmem [thread:$0]  (!%p1202_p5), %s1198_s6, 1024, %s1206_s8, %s1209_s10, %s1084_s11, %s1085_s4, %s1086_s7  }
  0x32   : > { %p1240_p2 = pnand %p614_p6, %p217_p1  ;;  %s605_s29 = sadd.s32 4294967295, %s1081_s25  }
  0x33   : > { %s606_s30 = sadd.s32 4294967294, %s1081_s25   ;;  %s34_s5 = sadd.s32 1, %s1073_s23 }
  0x34   : > { %p1247_p4 = scmp.eq.s32.totalorder %s605_s29, 0  ;;  %p35_p5 = scmp.ge.s32.totalorder %s34_s5, 3 }
  0x35   : > { %s76_s6 = sadd.s32 1, %s1049_s17  ;;  %p1506_p8 = scmp.ne.s32.totalorder %s1057_s19, %s1053_s18 }
  0x36   : > { %p83_p10 = scmp.ne.s32.totalorder %s1049_s17, %s1045_s16  ;;  %s1540_s5 = smov (%p35_p5, %s34_s5), 0 }
  0x37   : > { %p1257_p6 = por %p1247_p4, %p1506_p8  ;;  %1508 = sst [smem:[#allocation13_spill]] %s1540_s5 }
  0x38   : > { %s1542_s26 = smov (!%p35_p5, %s41_s26), %s1077_s24  ;;  %s73_s9 = ssub.s32 %s1073_s23, %s1540_s5 }
  0x39   : > { %s1507_s8 = scalar_select %p1257_p6, 1, 0 }
  0x3a   : > { %p1509_p0 = scmp.eq.s32.totalorder %s1081_s25, 0  ;;  %p43_p7 = scmp.ge.s32.totalorder %s1542_s26, 2 }
  0x3b   : > { %p74_p9 = scmp.eq.s32.totalorder %s73_s9, 0  ;;  %p89_p11 = scmp.ne.s32.totalorder %s1045_s16, %s1041_s15 }
  0x3c   : > { %p1272_p3 = por %p83_p10, %p1509_p0  ;;  %s132_s10 = sadd.s32 1, %s1037_s14 }
  0x3d   : > { %s1544_s26 = smov (%p43_p7, %s1542_s26), 0  ;;  %p1288_p12 = por %p89_p11, %p1247_p4 }
  0x3e   : > { %1511 = sst [smem:[#allocation14_spill]] %s1544_s26  ;;  %s46_s4 = ssub.s32 %s1077_s24, %s1544_s26 }
  0x3f   : > { %s1282_s11 = scalar_select %p74_p9, %s1049_s17, %s76_s6  }
  0x40   : > { %s1512_s7 = scalar_select %p1288_p12, 1, 0 }
  0x41   : > { %p48_p13 = scmp.eq.s32.totalorder %s46_s4, 0  ;;  %s127_s0 = sor.u32 %s73_s9, %s46_s4 }
  0x42   : > { %p130_p1 = scmp.eq.s32.totalorder %s127_s0, 0  ;;  %p142_p5 = scmp.ne.s32.totalorder %s1037_s14, %s1033_s13 }
  0x43   : > { %s1513_s15 = sadd.s32 1, %s1061_s20  ;;  %p143_p8 = scmp.eq.s32.totalorder %s605_s29, 5 }
  0x44   : > { %s1297_s5 = scalar_select %p48_p13, %s1061_s20, %s1513_s15  }
  0x45   : > { %s1300_s3 = scalar_select %p130_p1, %s1037_s14, %s132_s10  }
  0x46   : > { %p148_p10 = scmp.ne.s32.totalorder %s1033_s13, %s1029_s12  ;;  %p149_p0 = scmp.eq.s32.totalorder %s606_s30, 5 }
  0x47   : > { %s192_s6 = sand.u32 1, %s1049_s17   ;;  %p1305_p7 = por %p143_p8, %p142_p5 }
  0x48   : > { %p1309_p4 = por %p149_p0, %p148_p10  ;;  %s611_s0 = sshll.u32 %s192_s6, 6 }
  0x49   : > { %s1514_s27 = scalar_select %p1305_p7, 1, 0 }
  0x4a   : > { %s1515_s26 = scalar_select %p1309_p4, 1, 0 }
  0x4b   : > { %s641_s9 = sshll.u32 %s1073_s23, 10  ;;  %s196_s29 = scalar_lea.vmem [#allocation5], %s611_s0 }
  0x4c   : > { %s1317_s15 = scalar_lea.hbm %s1485_s1, %s641_s9  ;;  %s203_s30 = sshll.u32 %s196_s29, 4  ;;  %s1319_s30 = int_to_ptr.vmem [resolvable:$true] %s203_s30 }
  0x4d   : > { %p1516_p9 = scmp.lt.s32.totalorder %s1081_s25, 6  ;;  %s1329_s23 = scalar_lea.sflag [#allocation6], %s192_s6 }
  0x4e   : > { %s901_s24 = scalar_lea.hbm %s1317_s15, 1024  ;;  %s906_s18 = scalar_lea.hbm %s1485_s1, 3072 }
  0x4f   : > { %p1325_p11 = pnand %p1516_p9, %p1272_p3  ;;  %p902_p13 = scmp.ne.s32.totalorder %s1317_s15, %s901_s24 }
  0x50   : > { %p907_p3 = scmp.lt.u32.totalorder %s1317_s15, %s1485_s1  ;;  %p908_p10 = scmp.lt.u32.totalorder %s906_s18, %s901_s24 }
  0x51   : > { %p903_p1 = pneg %p1325_p11  ;;  %p910_p9 = scmp.lt.u32.totalorder %s901_s24, %s1317_s15 }
  0x52   : > { %p909_p0 = por %p908_p10, %p907_p3 }
  0x53   : > { %p904_p5 = pnand %p903_p1, %p902_p13 }
  0x54   : > { %p911_p4 = por %p910_p9, %p909_p0 }
  0x55   : > { %p905_p8 = pneg %p904_p5 }
  0x57   : > { %p912_p7 = pnand %p911_p4, %p905_p8 }
  0x59   : > { %915 = shalt.err (!%p912_p7)
}
  0x5a   : > { %s916_s6 = scalar_lea.vmem %s1319_s30, 1024  ;;  %s1087_s0 = smov [#allocation5]  }
  0x5b   : > { %p917_p13 = scmp.ne.s32.totalorder %s1319_s30, %s916_s6  ;;  %s921_s9 = sshll.u32 %s1087_s0, 4  ;;  %s922_s9 = int_to_ptr.vmem [resolvable:$false] %s921_s9 }
  0x5c   : > { %s923_s4 = scalar_lea.vmem %s922_s9, 2048  ;;  %p924_p6 = scmp.lt.s32.totalorder %s1319_s30, %s922_s9 }
  0x5d   : > { %p919_p5 = pnand %p917_p13, %p903_p1  ;;  %p925_p3 = scmp.lt.s32.totalorder %s923_s4, %s916_s6 }
  0x5f   : > { %p920_p12 = pneg %p919_p5  ;;  %p926_p10 = por %p925_p3, %p924_p6 }
  0x61   : > { %p927_p0 = pnand %p926_p10, %p920_p12 }
  0x63   : > { %930 = shalt.err (!%p927_p0)
}
  0x64   : > { %s1088_s24 = smov 64   ;;  %s1089_s18 = smov 4  }
  0x65   : > { %737 = dma.hbm_to_vmem [thread:$0]  (!%p1325_p11), %s1317_s15, 1024, %s1319_s30, %s1329_s23, %s1088_s24, %s1088_s24, %s1089_s18  }
  0x66   : > { %221 = sbr.rel (%p1240_p2) target bundleno = 413 (0x19d), region = 32  ;;  %s223_s29 = sand.u32 (!%p1240_p2), 1, %s1057_s19  }
  0x67   : > { %s615_s0 = sshll.u32 (!%p1240_p2), %s223_s29, 6  ;;  %s224_s9 = scalar_lea.sflag (!%p1240_p2), [#allocation3], %s223_s29 }
  0x68   : > { %s1360_s6 = scalar_lea.vmem (!%p1240_p2), [#allocation2], %s615_s0  ;;  %p1518_p6 = scmp.ne.s32.totalorder (!%p1240_p2), %s1507_s8, 0 }
  0x6d   : > { %1016 = dma.done.wait (%p1518_p6), %s224_s9, 1024  }
  0x6e   : > { %1018 = vsyncadd (%p1518_p6), %s224_s9, 4294966272  ;;  %s232_s4 = sand.u32 1, %s1045_s16   ;;  %p1519_p2 = scmp.ne.s32.totalorder %s1512_s7, 0 }
  0x6f   : > { %s616_s10 = sshll.u32 %s232_s4, 6  ;;  %s233_s23 = scalar_lea.sflag [#allocation6], %s232_s4 }
  0x70   : > { %s1367_s15 = scalar_lea.vmem [#allocation5], %s616_s10 }
  0x71   : > { %1020 = dma.done.wait (%p1519_p2), %s233_s23, 1024  }
  0x72   : > { %1022 = vsyncadd (%p1519_p2), %s233_s23, 4294966272  ;;  %v863_v0 = vld [vmem:[%s1367_s15] sm:$0xff]   ;;  %v864_v1 = vld [vmem:[%s1367_s15 + $0x8] sm:$0xff]   ;;  %p268_p12 = scmp.lt.s32.totalorder %s1065_s21, 2  ;;  %s264_s28 = sand.u32 1, %s1033_s13  }
  0x73   : > { %685 = vmatprep.subr.bf16.mxu0 %v863_v0  ;;  %709 = vmatprep.subr.bf16.mxu1 %v863_v0  ;;  %v865_v2 = vld [vmem:[%s1367_s15 + $0x10] sm:$0xff]   ;;  %v273_v3 = vld [vmem:[%s1360_s6] sm:$0xff]  ;;  %v274_v4 = vld [vmem:[%s1360_s6 + $0x8] sm:$0xff]  ;;  %s617_s7 = sshll.u32 %s264_s28, 5  ;;  %s636_s30 = sshll.u32 %s1069_s22, 3 }
  0x74   : > { %686 = vmatpush3.bf16.xpose.msra.mxu0 %v863_v0  ;;  %717 = vmatpush3.bf16.xpose.msra.mxu1 %v863_v0  ;;  %v277_v5 = vld [vmem:[%s1360_s6 + $0x20] sm:$0xff]  ;;  %v281_v6 = vpack.c.bf16 %v274_v4, %v273_v3  ;;  %v278_v7 = vld [vmem:[%s1360_s6 + $0x28] sm:$0xff]  ;;  %v866_v9 = vld [vmem:[%s1367_s15 + $0x18] sm:$0xff]   ;;  %s269_s8 = scalar_select %p268_p12, %s1065_s21, 2 }
  0x75   : > { %687 = vmatprep.subr.bf16.mxu0 %v864_v1  ;;  %710 = vmatprep.subr.bf16.mxu1 %v864_v1  ;;  %v283_v8 = vpack.c.bf16 %v278_v7, %v277_v5  ;;  %v867_v10 = vld [vmem:[%s1367_s15 + $0x20] sm:$0xff]   ;;  %v868_v11 = vld [vmem:[%s1367_s15 + $0x28] sm:$0xff]   ;;  %v869_v12 = vld [vmem:[%s1367_s15 + $0x30] sm:$0xff]   ;;  %s637_s24 = sshll.u32 %s1065_s21, 4  ;;  %s1520_s23 = sld [smem:[#allocation16_spill]] }
  0x76   : > { %701 = vmatprep.mubr.bf16.mxu0 %v281_v6  ;;  %v870_v13 = vld [vmem:[%s1367_s15 + $0x38] sm:$0xff]   ;;  %v275_v14 = vld [vmem:[%s1360_s6 + $0x10] sm:$0xff]  ;;  %s270_s0 = scalar_lea.vmem %s1486_s2, %s269_s8  ;;  %s476_s9 = sadd.s32 %s637_s24, %s636_s30 }
  0x77   : > { %705 = vmatprep.mubr.bf16.mxu1 %v283_v8  ;;  %v276_v15 = vld [vmem:[%s1360_s6 + $0x18] sm:$0xff]  ;;  %v279_v16 = vld [vmem:[%s1360_s6 + $0x30] sm:$0xff]  ;;  %v618_v21 = vld [vmem:[%s270_s0] ss:$0 sm:$0xff]  ;;  %s638_s10 = sshll.u32 %s476_s9, 6  ;;  %p1522_p4 = scmp.ne.s32.totalorder %s1514_s27, 0 }
  0x78   : > { %v280_v17 = vld [vmem:[%s1360_s6 + $0x38] sm:$0xff]  ;;  %v282_v18 = vpack.c.bf16 %v276_v15, %v275_v14  ;;  %s266_s6 = scalar_lea.vmem [#allocation7], %s617_s7  ;;  %s1408_s7 = scalar_lea.sflag [#allocation4], %s264_s28 }
  0x79   : > { %v284_v19 = vpack.c.bf16 %v280_v17, %v279_v16  ;;  %s479_s4 = sshll.u32 %s266_s6, 4  ;;  %s1090_s24 = smov [#allocation7]   ;;  %s1399_s4 = int_to_ptr.vmem [resolvable:$true] %s479_s4 }
  0x7a   : > { %s931_s30 = scalar_lea.vmem %s1399_s4, 512  ;;  %s935_s18 = sshll.u32 %s1090_s24, 4  ;;  %s936_s18 = int_to_ptr.vmem [resolvable:$false] %s935_s18 }
  0x7b   : > { %s1521_s8 = smov %s1520_s23  ;;  %s1404_s15 = scalar_lea.hbm %s1520_s23, %s638_s10 }
  0x7c   : > { %688 = vmatpush3.bf16.xpose.msra.mxu0 %v864_v1  ;;  %718 = vmatpush3.bf16.xpose.msra.mxu1 %v864_v1  ;;  %p932_p7 = scmp.ne.s32.totalorder %s1399_s4, %s931_s30  ;;  %s937_s29 = scalar_lea.vmem %s936_s18, 1024 }
  0x7d   : > { %689 = vmatprep.subr.bf16.mxu0 %v865_v2  ;;  %711 = vmatprep.subr.bf16.mxu1 %v865_v2  ;;  %p938_p8 = scmp.lt.s32.totalorder %s1399_s4, %s936_s18  ;;  %p939_p9 = scmp.lt.s32.totalorder %s937_s29, %s931_s30 }
  0x7e   : > { %p933_p11 = pnand %p932_p7, %p1522_p4 }
  0x7f   : > { %p940_p13 = por %p939_p9, %p938_p8 }
  0x80   : > { %p934_p1 = pneg %p933_p11 }
  0x82   : > { %p941_p5 = pnand %p940_p13, %p934_p1 }
  0x84   : > { %690 = vmatpush3.bf16.xpose.msra.mxu0 %v865_v2  ;;  %719 = vmatpush3.bf16.xpose.msra.mxu1 %v865_v2 }
  0x85   : > { %691 = vmatprep.subr.bf16.mxu0 %v866_v9  ;;  %712 = vmatprep.subr.bf16.mxu1 %v866_v9 }
  0x8c   : > { %692 = vmatpush3.bf16.xpose.msra.mxu0 %v866_v9  ;;  %720 = vmatpush3.bf16.xpose.msra.mxu1 %v866_v9 }
  0x8d   : > { %693 = vmatprep.subr.bf16.mxu0 %v867_v10  ;;  %713 = vmatprep.subr.bf16.mxu1 %v867_v10 }
  0x94   : > { %694 = vmatpush3.bf16.xpose.msra.mxu0 %v867_v10  ;;  %721 = vmatpush3.bf16.xpose.msra.mxu1 %v867_v10 }
  0x95   : > { %695 = vmatprep.subr.bf16.mxu0 %v868_v11  ;;  %714 = vmatprep.subr.bf16.mxu1 %v868_v11 }
  0x9c   : > { %696 = vmatpush3.bf16.xpose.msra.mxu0 %v868_v11  ;;  %722 = vmatpush3.bf16.xpose.msra.mxu1 %v868_v11 }
  0x9d   : > { %697 = vmatprep.subr.bf16.mxu0 %v869_v12  ;;  %715 = vmatprep.subr.bf16.mxu1 %v869_v12 }
  0xa4   : > { %698 = vmatpush3.bf16.xpose.msra.mxu0 %v869_v12  ;;  %723 = vmatpush3.bf16.xpose.msra.mxu1 %v869_v12 }
  0xa5   : > { %699 = vmatprep.subr.bf16.mxu0 %v870_v13  ;;  %716 = vmatprep.subr.bf16.mxu1 %v870_v13 }
  0xac   : > { %700 = vmatpush3.bf16.xpose.msra.mxu0 %v870_v13  ;;  %724 = vmatpush3.bf16.xpose.msra.mxu1 %v870_v13 }
  0xb3   : > { %702 = vmatmul.mubr.bf16.vlgmr.msra.gmra.mrb[0].mxu0 %v282_v18  ;;  %706 = vmatmul.mubr.bf16.vlgmr.msra.gmra.mrb[0].mxu1 %v284_v19 }
 0x186   : > { %v703_v20 = vpop.f32.mrb[0].mxu0  ;;  %v707_v22 = vpop.f32.mrb[0].mxu1 }
 0x187   : > { %v390_v23 = vpop.f32.mrb[1].mxu0  ;;  %v406_v24 = vpop.f32.mrb[1].mxu1  ;;  %v399_v27 = vadd.f32 %v703_v20, %v618_v21  ;;  %v415_v28 = vadd.f32 %v707_v22, %v618_v21 }
 0x188   : > { %v704_v25 = vpop.f32.mrb[2].mxu0  ;;  %v708_v26 = vpop.f32.mrb[2].mxu1  ;;  %v391_v33 = vadd.f32 %v618_v21, %v390_v23  ;;  %v407_v34 = vadd.f32 %v618_v21, %v406_v24 }
 0x189   : > { %v402_v29 = vadd.f32 %v704_v25, %v618_v21  ;;  %v418_v30 = vadd.f32 %v708_v26, %v618_v21  ;;  %v393_v31 = vpop.f32.mrb[3].mxu0  ;;  %v409_v32 = vpop.f32.mrb[3].mxu1 }
 0x18a   : > { %v394_v35 = vadd.f32 %v618_v21, %v393_v31  ;;  %v410_v36 = vadd.f32 %v618_v21, %v409_v32 }
 0x18b   : > { %v658_v37 = vpack.c.bf16 %v402_v29, %v399_v27  ;;  %v668_v38 = vpack.c.bf16 %v418_v30, %v415_v28 }
 0x18c   : > { %v653_v39 = vpack.c.bf16 %v394_v35, %v391_v33  ;;  %v663_v40 = vpack.c.bf16 %v410_v36, %v407_v34 }
 0x18d   : > { %670 = vst [vmem:[%s266_s6 + $0x8] sm:$0xff] %v658_v37   ;;  %672 = vst [vmem:[%s266_s6 + $0x18] sm:$0xff] %v668_v38  }
 0x18e   : > { %654 = vst [vmem:[%s266_s6] sm:$0xff] %v653_v39   ;;  %671 = vst [vmem:[%s266_s6 + $0x10] sm:$0xff] %v663_v40  }
 0x18f   : > { %944 = shalt.err (!%p941_p5)
}
 0x190   : > { %s945_s28 = scalar_lea.hbm %s1404_s15, 512  ;;  %s949_s6 = scalar_lea.hbm %s1521_s8, 3072 }
 0x191   : > { %p946_p3 = scmp.ne.s32.totalorder %s1404_s15, %s945_s28  ;;  %p950_p6 = scmp.lt.u32.totalorder %s1404_s15, %s1521_s8 }
 0x192   : > { %p951_p2 = scmp.lt.u32.totalorder %s949_s6, %s945_s28  ;;  %p953_p7 = scmp.lt.u32.totalorder %s945_s28, %s1404_s15 }
 0x193   : > { %p947_p10 = pnand %p946_p3, %p1522_p4 }
 0x194   : > { %p952_p12 = por %p951_p2, %p950_p6 }
 0x195   : > { %p948_p0 = pneg %p947_p10 }
 0x196   : > { %p954_p11 = por %p953_p7, %p952_p12 }
 0x198   : > { %p955_p1 = pnand %p954_p11, %p948_p0 }
 0x19a   : > { %958 = shalt.err (!%p955_p1)
}
 0x19b   : > { %s1091_s22 = smov 64   ;;  %s1092_s23 = smov 4  }
 0x19c   : > { %729 = dma.vmem_to_hbm [thread:$0]  (%p1522_p4), %s1399_s4, 512, %s1404_s15, %s1408_s7, %s1091_s22, %s1091_s22, %s1092_s23  }
 0x19d PF: > { %p743_p8 = scmp.ge.s32.totalorder %s1081_s25, 2  ;;  %s494_s30 = sand.u32 1, %s1029_s12  }
 0x19e   : > { %p1523_p9 = scmp.ne.s32.totalorder %s1515_s26, 0  ;;  %s495_s24 = scalar_lea.sflag [#allocation4], %s494_s30 }
 0x1a0   : > { %p739_p13 = pnand %p743_p8, %p1523_p9 }
 0x1a2   : > { %1024 = dma.done.wait (!%p739_p13), %s495_s24, 512  }
 0x1a3   : > { %1026 = vsyncadd (!%p739_p13), %s495_s24, 4294966784  ;;  %s22_s25 = sadd.s32 1, %s1081_s25   ;;  %s1525_s21 = sld [smem:[#allocation11_spill]] }
 0x1a4   : > { %p1437_p5 = scmp.ge.s32.totalorder %s22_s25, 8   ;;  %s1526_s22 = sld [smem:[#allocation12_spill]] }
 0x1a5   : > { %s1527_s23 = sld [smem:[#allocation13_spill]]  ;;  %s1528_s24 = sld [smem:[#allocation14_spill]] }
 0x1a6   : > { %s1530_s12 = smov %s1033_s13  ;;  %s1531_s13 = smov %s1037_s14 }
 0x1a7   : > { %s1532_s14 = smov %s1300_s3  ;;  %s1533_s15 = smov %s1045_s16 }
 0x1a8   : > { %s1534_s16 = smov %s1049_s17  ;;  %s1535_s17 = smov %s1282_s11 }
 0x1a9   : > { %s1536_s18 = smov %s1057_s19  ;;  %s1537_s19 = smov %s1061_s20 }
 0x1aa   : > { %s1538_s20 = smov %s1297_s5  ;;  %21 = sbr.rel (!%p1437_p5) target bundleno = 15 (0xf), region = 93 }
 0x1b1   :  { %500 = vsyncpa [#allocation3], 1 }
 0x1b2   :  { %502 = vsyncpa [#allocation3 + $0x1], 1 }
 0x1b3   :  { %503 = vsyncpa [#allocation6], 1 }
 0x1b4   :  { %505 = vsyncpa [#allocation6 + $0x1], 1 }
 0x1b5   :  { %506 = vsyncpa [#allocation4], 1 }
 0x1b6   :  { %508 = vsyncpa [#allocation4 + $0x1], 1 }

</bundles_post_ra>
